<compile_context>
chip_gen: v6e
topology: v6e:2x2x1
jax: 0.10.0
libtpu: 0.0.40
codegen_flags: <defaults>
</compile_context>

<pallas_src>
import functools

import jax
import jax.numpy as jnp
from jax.experimental import pallas as pl
from jax.experimental.pallas import tpu as pltpu

_LANES = 128
_SUBLANES = 8
# ~1M elements per operand block => 4 MiB f32 working set per operand.
_BLOCK_ELEMS = 1 << 20
_VMEM_LIMIT = 40 * 1024 * 1024


def _cmd_kernel(x1_ref, x2_ref, out_ref, *, n_moments, inv_n, n_groups):
    """One feature chunk: per-moment partial sums of squared differences.

    Writes an (n_rows, 128) block: row k-1 holds this chunk's contribution to
    sum_f (E[sx1^k]_f - E[sx2^k]_f)^2, folded into 128 lanes (row 0 holds the
    plain mean-difference term).  The tiny cross-chunk / cross-lane reduce,
    sqrt, and sum over moments happen outside the kernel.
    """
    inv_n_f = jnp.float32(inv_n)

    def central_moments(x):
        # x: (N, d_tile) float32
        m = jnp.sum(x, axis=0, keepdims=True) * inv_n_f           # (1, d_tile)
        s = x - m
        moms = [m]
        p = s
        for _ in range(2, n_moments + 1):
            p = p * s                                             # s^k via VPU multiplies
            moms.append(jnp.sum(p, axis=0, keepdims=True) * inv_n_f)
        return moms

    # Process x1 fully, then x2: only the small (1, d_tile) moment rows stay
    # live between the two passes, halving block-sized f32 temporaries.
    m1 = central_moments(x1_ref[...].astype(jnp.float32))
    m2 = central_moments(x2_ref[...].astype(jnp.float32))

    out_ref[...] = jnp.zeros_like(out_ref)
    for k in range(n_moments):
        dk = m1[k] - m2[k]                                        # (1, d_tile)
        d2 = dk * dk
        # Fold per-feature squared diffs into one 128-lane vector with
        # lane-aligned static slices: pure VPU adds, no cross-lane XLU work.
        folded = d2[:, :_LANES]
        for g in range(1, n_groups):
            folded = folded + d2[:, g * _LANES:(g + 1) * _LANES]
        out_ref[k, :] = folded[0, :]


def cmd(x1, x2, n_moments, *, block_elems=_BLOCK_ELEMS):
    """Pallas TPU implementation of CMD.forward(x1, x2, n_moments)."""
    assert x1.shape == x2.shape, "x1/x2 shape mismatch"
    assert x1.ndim == 2, "CMD expects (batch, features) inputs"
    n_moments = int(n_moments)  # Python-level loop bound, as in the torch module
    assert 1 <= n_moments <= 128

    n, d = x1.shape
    assert n >= 1 and d >= 1

    # TODO(synk): tile the batch axis (two-pass raw->central moments) for
    # N > block_elems // 128; for now a full-batch 128-lane block must fit.
    assert n * _LANES <= block_elems, (
        f"batch={n} too large for a single-block batch axis "
        f"(max {block_elems // _LANES})")

    # Feature tile: largest lane-aligned width whose (N, d_tile) block stays
    # within the element budget.
    cap_lanes = (block_elems // n) // _LANES            # >= 1 by assert above
    d_lanes = pl.cdiv(d, _LANES)
    tile_lanes = min(cap_lanes, d_lanes)
    d_tile = tile_lanes * _LANES
    n_chunks = pl.cdiv(d, d_tile)
    d_padded = n_chunks * d_tile

    # Zero-pad the feature axis so every chunk is full.  Zero columns have
    # zero mean and zero centered powers in BOTH inputs, so they contribute
    # exactly 0 to every moment difference.
    if d_padded != d:
        pad = ((0, 0), (0, d_padded - d))
        x1 = jnp.pad(x1, pad)
        x2 = jnp.pad(x2, pad)

    n_rows = ((n_moments + _SUBLANES - 1) // _SUBLANES) * _SUBLANES

    kernel = functools.partial(
        _cmd_kernel,
        n_moments=n_moments,
        inv_n=1.0 / float(n),
        n_groups=d_tile // _LANES,
    )

    partials = pl.pallas_call(
        kernel,
        out_shape=jax.ShapeDtypeStruct((n_chunks * n_rows, _LANES), jnp.float32),
        grid_spec=pltpu.PrefetchScalarGridSpec(
            num_scalar_prefetch=0,
            grid=(n_chunks,),
            in_specs=[
                pl.BlockSpec((n, d_tile), lambda j: (0, j)),
                pl.BlockSpec((n, d_tile), lambda j: (0, j)),
            ],
            out_specs=pl.BlockSpec((n_rows, _LANES), lambda j: (j, 0)),
        ),
        compiler_params=pltpu.CompilerParams(
            dimension_semantics=("parallel",),
            vmem_limit_bytes=_VMEM_LIMIT,
        ),
    )(x1, x2)

    # Tiny finalization in plain JAX: sum partials over chunks + lanes per
    # moment, sqrt, sum over moments.
    partials = partials.reshape(n_chunks, n_rows, _LANES)
    per_moment = jnp.sum(partials[:, :n_moments, :], axis=(0, 2))
    return jnp.sum(jnp.sqrt(per_moment))


def cmd_reference(x1, x2, n_moments):
    """Pure-JAX reference mirroring the torch CMD module."""
    x1 = x1.astype(jnp.float32)
    x2 = x2.astype(jnp.float32)
    mx1 = jnp.mean(x1, axis=0)
    mx2 = jnp.mean(x2, axis=0)
    sx1 = x1 - mx1
    sx2 = x2 - mx2

    def matchnorm(a, b):
        return jnp.sum((a - b) ** 2) ** 0.5

    scms = matchnorm(mx1, mx2)
    for i in range(n_moments - 1):
        k = i + 2
        scms = scms + matchnorm(jnp.mean(sx1 ** k, 0), jnp.mean(sx2 ** k, 0))
    return scms


if __name__ == "__main__":
    key = jax.random.PRNGKey(0)
    k1, k2, k3, k4 = jax.random.split(key, 4)

    # MISA-sized utterance representations: (batch, hidden).
    batch, hidden, n_moments = 16, 32, 5
    x1 = jax.random.normal(k1, (batch, hidden), dtype=jnp.float32)
    x2 = jax.random.normal(k2, (batch, hidden), dtype=jnp.float32) * 0.9 + 0.1

    out = cmd(x1, x2, n_moments)
    jax.block_until_ready(out)
    ref = cmd_reference(x1, x2, n_moments)
    assert jnp.allclose(out, ref, rtol=1e-4, atol=1e-5), (out, ref)

    # Ragged batch / multi-vreg feature width (exercises the in-kernel fold).
    y1 = jax.random.normal(k3, (10, 384), dtype=jnp.float32)
    y2 = jax.random.normal(k4, (10, 384), dtype=jnp.float32) * 1.1 - 0.05
    out2 = cmd(y1, y2, 3)
    jax.block_until_ready(out2)
    ref2 = cmd_reference(y1, y2, 3)
    assert jnp.allclose(out2, ref2, rtol=1e-4, atol=1e-5), (out2, ref2)

    # Multi-chunk ("parallel" grid) path, forced with a tiny block budget.
    out3 = cmd(y1, y2, 4, block_elems=10 * _LANES)
    jax.block_until_ready(out3)
    ref3 = cmd_reference(y1, y2, 4)
    assert jnp.allclose(out3, ref3, rtol=1e-4, atol=1e-5), (out3, ref3)

    print("KERNEL_OK")
</pallas_src>

<mosaic_0001>
module attributes {stable_mosaic.version = 11 : i64} {
  func.func @_cmd_kernel(%arg0: i32, %arg1: memref<16x128xf32, #tpu.memory_space<vmem>>, %arg2: memref<16x128xf32, #tpu.memory_space<vmem>>, %arg3: memref<8x128xf32, #tpu.memory_space<vmem>>) attributes {dimension_semantics = [#tpu.dimension_semantics<parallel>], iteration_bounds = array<i64: 1>, scalar_prefetch = 0 : i64, scratch_operands = 0 : i64, tpu.core_type = #tpu.core_type<tc>, window_params = [{transform_indices = @transform_0, window_bounds = array<i64: 16, 128>}, {transform_indices = @transform_1, window_bounds = array<i64: 16, 128>}, {transform_indices = @transform_2, window_bounds = array<i64: 8, 128>}]} {
    %c0 = arith.constant 0 : index
    %c0_0 = arith.constant 0 : index
    %0 = vector.load %arg1[%c0, %c0_0] : memref<16x128xf32, #tpu.memory_space<vmem>>, vector<16x128xf32>
    %cst = arith.constant dense<0.000000e+00> : vector<128xf32>
    %1 = vector.multi_reduction <add>, %0, %cst [0] : vector<16x128xf32> to vector<128xf32>
    %2 = vector.shape_cast %1 : vector<128xf32> to vector<1x128xf32>
    %cst_1 = arith.constant 6.250000e-02 : f32
    %3 = vector.broadcast %cst_1 : f32 to vector<1x128xf32>
    %4 = arith.mulf %2, %3 : vector<1x128xf32>
    %5 = vector.broadcast %4 : vector<1x128xf32> to vector<16x128xf32>
    %6 = arith.subf %0, %5 : vector<16x128xf32>
    %7 = arith.mulf %6, %6 : vector<16x128xf32>
    %cst_2 = arith.constant dense<0.000000e+00> : vector<128xf32>
    %8 = vector.multi_reduction <add>, %7, %cst_2 [0] : vector<16x128xf32> to vector<128xf32>
    %9 = vector.shape_cast %8 : vector<128xf32> to vector<1x128xf32>
    %cst_3 = arith.constant 6.250000e-02 : f32
    %10 = vector.broadcast %cst_3 : f32 to vector<1x128xf32>
    %11 = arith.mulf %9, %10 : vector<1x128xf32>
    %12 = arith.mulf %7, %6 : vector<16x128xf32>
    %cst_4 = arith.constant dense<0.000000e+00> : vector<128xf32>
    %13 = vector.multi_reduction <add>, %12, %cst_4 [0] : vector<16x128xf32> to vector<128xf32>
    %14 = vector.shape_cast %13 : vector<128xf32> to vector<1x128xf32>
    %cst_5 = arith.constant 6.250000e-02 : f32
    %15 = vector.broadcast %cst_5 : f32 to vector<1x128xf32>
    %16 = arith.mulf %14, %15 : vector<1x128xf32>
    %17 = arith.mulf %12, %6 : vector<16x128xf32>
    %cst_6 = arith.constant dense<0.000000e+00> : vector<128xf32>
    %18 = vector.multi_reduction <add>, %17, %cst_6 [0] : vector<16x128xf32> to vector<128xf32>
    %19 = vector.shape_cast %18 : vector<128xf32> to vector<1x128xf32>
    %cst_7 = arith.constant 6.250000e-02 : f32
    %20 = vector.broadcast %cst_7 : f32 to vector<1x128xf32>
    %21 = arith.mulf %19, %20 : vector<1x128xf32>
    %22 = arith.mulf %17, %6 : vector<16x128xf32>
    %cst_8 = arith.constant dense<0.000000e+00> : vector<128xf32>
    %23 = vector.multi_reduction <add>, %22, %cst_8 [0] : vector<16x128xf32> to vector<128xf32>
    %24 = vector.shape_cast %23 : vector<128xf32> to vector<1x128xf32>
    %cst_9 = arith.constant 6.250000e-02 : f32
    %25 = vector.broadcast %cst_9 : f32 to vector<1x128xf32>
    %26 = arith.mulf %24, %25 : vector<1x128xf32>
    %c0_10 = arith.constant 0 : index
    %c0_11 = arith.constant 0 : index
    %27 = vector.load %arg2[%c0_10, %c0_11] : memref<16x128xf32, #tpu.memory_space<vmem>>, vector<16x128xf32>
    %cst_12 = arith.constant dense<0.000000e+00> : vector<128xf32>
    %28 = vector.multi_reduction <add>, %27, %cst_12 [0] : vector<16x128xf32> to vector<128xf32>
    %29 = vector.shape_cast %28 : vector<128xf32> to vector<1x128xf32>
    %cst_13 = arith.constant 6.250000e-02 : f32
    %30 = vector.broadcast %cst_13 : f32 to vector<1x128xf32>
    %31 = arith.mulf %29, %30 : vector<1x128xf32>
    %32 = vector.broadcast %31 : vector<1x128xf32> to vector<16x128xf32>
    %33 = arith.subf %27, %32 : vector<16x128xf32>
    %34 = arith.mulf %33, %33 : vector<16x128xf32>
    %cst_14 = arith.constant dense<0.000000e+00> : vector<128xf32>
    %35 = vector.multi_reduction <add>, %34, %cst_14 [0] : vector<16x128xf32> to vector<128xf32>
    %36 = vector.shape_cast %35 : vector<128xf32> to vector<1x128xf32>
    %cst_15 = arith.constant 6.250000e-02 : f32
    %37 = vector.broadcast %cst_15 : f32 to vector<1x128xf32>
    %38 = arith.mulf %36, %37 : vector<1x128xf32>
    %39 = arith.mulf %34, %33 : vector<16x128xf32>
    %cst_16 = arith.constant dense<0.000000e+00> : vector<128xf32>
    %40 = vector.multi_reduction <add>, %39, %cst_16 [0] : vector<16x128xf32> to vector<128xf32>
    %41 = vector.shape_cast %40 : vector<128xf32> to vector<1x128xf32>
    %cst_17 = arith.constant 6.250000e-02 : f32
    %42 = vector.broadcast %cst_17 : f32 to vector<1x128xf32>
    %43 = arith.mulf %41, %42 : vector<1x128xf32>
    %44 = arith.mulf %39, %33 : vector<16x128xf32>
    %cst_18 = arith.constant dense<0.000000e+00> : vector<128xf32>
    %45 = vector.multi_reduction <add>, %44, %cst_18 [0] : vector<16x128xf32> to vector<128xf32>
    %46 = vector.shape_cast %45 : vector<128xf32> to vector<1x128xf32>
    %cst_19 = arith.constant 6.250000e-02 : f32
    %47 = vector.broadcast %cst_19 : f32 to vector<1x128xf32>
    %48 = arith.mulf %46, %47 : vector<1x128xf32>
    %49 = arith.mulf %44, %33 : vector<16x128xf32>
    %cst_20 = arith.constant dense<0.000000e+00> : vector<128xf32>
    %50 = vector.multi_reduction <add>, %49, %cst_20 [0] : vector<16x128xf32> to vector<128xf32>
    %51 = vector.shape_cast %50 : vector<128xf32> to vector<1x128xf32>
    %cst_21 = arith.constant 6.250000e-02 : f32
    %52 = vector.broadcast %cst_21 : f32 to vector<1x128xf32>
    %53 = arith.mulf %51, %52 : vector<1x128xf32>
    %cst_22 = arith.constant 0.000000e+00 : f32
    %54 = vector.broadcast %cst_22 : f32 to vector<8x128xf32>
    %c0_23 = arith.constant 0 : index
    %c0_24 = arith.constant 0 : index
    %55 = vector.load %arg3[%c0_23, %c0_24] : memref<8x128xf32, #tpu.memory_space<vmem>>, vector<8x128xf32>
    tpu.vector_store %arg3[%c0_23, %c0_24], %54 {strides = array<i32>} : memref<8x128xf32, #tpu.memory_space<vmem>>, vector<8x128xf32>,
    %56 = arith.subf %4, %31 : vector<1x128xf32>
    %57 = arith.mulf %56, %56 : vector<1x128xf32>
    %58 = vector.shape_cast %57 : vector<1x128xf32> to vector<128xf32>
    %c0_25 = arith.constant 0 : index
    %c0_26 = arith.constant 0 : index
    %59 = vector.load %arg3[%c0_25, %c0_26] : memref<8x128xf32, #tpu.memory_space<vmem>>, vector<1x128xf32>
    %60 = vector.shape_cast %59 : vector<1x128xf32> to vector<128xf32>
    %61 = vector.shape_cast %58 : vector<128xf32> to vector<1x128xf32>
    tpu.vector_store %arg3[%c0_25, %c0_26], %61 {strides = array<i32>} : memref<8x128xf32, #tpu.memory_space<vmem>>, vector<1x128xf32>,
    %62 = arith.subf %11, %38 : vector<1x128xf32>
    %63 = arith.mulf %62, %62 : vector<1x128xf32>
    %64 = vector.shape_cast %63 : vector<1x128xf32> to vector<128xf32>
    %c1 = arith.constant 1 : index
    %c0_27 = arith.constant 0 : index
    %65 = vector.load %arg3[%c1, %c0_27] : memref<8x128xf32, #tpu.memory_space<vmem>>, vector<1x128xf32>
    %66 = vector.shape_cast %65 : vector<1x128xf32> to vector<128xf32>
    %67 = vector.shape_cast %64 : vector<128xf32> to vector<1x128xf32>
    tpu.vector_store %arg3[%c1, %c0_27], %67 {strides = array<i32>} : memref<8x128xf32, #tpu.memory_space<vmem>>, vector<1x128xf32>,
    %68 = arith.subf %16, %43 : vector<1x128xf32>
    %69 = arith.mulf %68, %68 : vector<1x128xf32>
    %70 = vector.shape_cast %69 : vector<1x128xf32> to vector<128xf32>
    %c2 = arith.constant 2 : index
    %c0_28 = arith.constant 0 : index
    %71 = vector.load %arg3[%c2, %c0_28] : memref<8x128xf32, #tpu.memory_space<vmem>>, vector<1x128xf32>
    %72 = vector.shape_cast %71 : vector<1x128xf32> to vector<128xf32>
    %73 = vector.shape_cast %70 : vector<128xf32> to vector<1x128xf32>
    tpu.vector_store %arg3[%c2, %c0_28], %73 {strides = array<i32>} : memref<8x128xf32, #tpu.memory_space<vmem>>, vector<1x128xf32>,
    %74 = arith.subf %21, %48 : vector<1x128xf32>
    %75 = arith.mulf %74, %74 : vector<1x128xf32>
    %76 = vector.shape_cast %75 : vector<1x128xf32> to vector<128xf32>
    %c3 = arith.constant 3 : index
    %c0_29 = arith.constant 0 : index
    %77 = vector.load %arg3[%c3, %c0_29] : memref<8x128xf32, #tpu.memory_space<vmem>>, vector<1x128xf32>
    %78 = vector.shape_cast %77 : vector<1x128xf32> to vector<128xf32>
    %79 = vector.shape_cast %76 : vector<128xf32> to vector<1x128xf32>
    tpu.vector_store %arg3[%c3, %c0_29], %79 {strides = array<i32>} : memref<8x128xf32, #tpu.memory_space<vmem>>, vector<1x128xf32>,
    %80 = arith.subf %26, %53 : vector<1x128xf32>
    %81 = arith.mulf %80, %80 : vector<1x128xf32>
    %82 = vector.shape_cast %81 : vector<1x128xf32> to vector<128xf32>
    %c4 = arith.constant 4 : index
    %c0_30 = arith.constant 0 : index
    %83 = vector.load %arg3[%c4, %c0_30] : memref<8x128xf32, #tpu.memory_space<vmem>>, vector<1x128xf32>
    %84 = vector.shape_cast %83 : vector<1x128xf32> to vector<128xf32>
    %85 = vector.shape_cast %82 : vector<128xf32> to vector<1x128xf32>
    tpu.vector_store %arg3[%c4, %c0_30], %85 {strides = array<i32>} : memref<8x128xf32, #tpu.memory_space<vmem>>, vector<1x128xf32>,
    return
  }
  func.func @transform_0(%arg0: i32) -> (i32, i32) {
    %c0_i32 = arith.constant 0 : i32
    %c0_i32_0 = arith.constant 0 : i32
    return %c0_i32, %arg0 : i32, i32
  }
  func.func @transform_1(%arg0: i32) -> (i32, i32) {
    %c0_i32 = arith.constant 0 : i32
    %c0_i32_0 = arith.constant 0 : i32
    return %c0_i32, %arg0 : i32, i32
  }
  func.func @transform_2(%arg0: i32) -> (i32, i32) {
    %c0_i32 = arith.constant 0 : i32
    %c0_i32_0 = arith.constant 0 : i32
    return %arg0, %c0_i32 : i32, i32
  }
}

</mosaic_0001>

<bundles_post_ra>
// kernel: tpu_custom_call.1
= control target key start
LH: loop header
LB: loop body
LE: loop exit
PB: predicated region body
PF: predicated region fallthrough
CT: control target
= control target key end

     0   :  { %7 = vsyncpa [#allocation3], 0  ;;  %s278_s0 = inlined_call_operand.hbm [shape: f32[16,128], index: 0, kind: input, shape index: {}]   ;;  %s279_s1 = inlined_call_operand.hbm [shape: f32[16,128], index: 1, kind: input, shape index: {}]   ;;  %s280_s2 = inlined_call_operand.hbm [shape: f32[8,128], index: 2, kind: output, shape index: {}]  }
   0x1   :  { %8 = vsyncpa [#allocation6], 0 }
   0x2   :  { %9 = vsyncpa [#allocation4], 0  ;;  %s248_s9 = smov [#allocation2]  }
   0x3   :  { %s15_s10 = sshll.u32 %s248_s9, 4  ;;  %s16_s10 = int_to_ptr.vmem [resolvable:$true] %s15_s10 }
   0x4   :  { %s190_s11 = scalar_lea.vmem %s16_s10, 256  ;;  %p195_p1 = scmp.lt.s32.totalorder %s16_s10, %s16_s10 }
   0x5   :  { %p191_p0 = scmp.ne.s32.totalorder %s16_s10, %s190_s11  ;;  %p196_p2 = scmp.lt.s32.totalorder %s190_s11, %s190_s11 }
   0x7   :  { %p197_p3 = por %p196_p2, %p195_p1 }
   0x9   :  { %p198_p4 = pnand %p197_p3, %p191_p0 }
   0xb   :  { %201 = shalt.err (!%p198_p4)
}
   0xc   :  { %s249_s12 = smov 128   ;;  %s250_s13 = smov 8  }
   0xd   :  { %21 = dma.hbm_to_vmem [thread:$0]  %s278_s0, 256, %s16_s10, [#allocation3], %s249_s12, %s249_s12, %s250_s13  }
   0xe   :  { %s251_s16 = smov [#allocation5]  }
   0xf   :  { %s27_s17 = sshll.u32 %s251_s16, 4  ;;  %s28_s17 = int_to_ptr.vmem [resolvable:$true] %s27_s17 }
  0x10   :  { %s210_s18 = scalar_lea.vmem %s28_s17, 256  ;;  %p215_p6 = scmp.lt.s32.totalorder %s28_s17, %s28_s17 }
  0x11   :  { %p211_p5 = scmp.ne.s32.totalorder %s28_s17, %s210_s18  ;;  %p216_p7 = scmp.lt.s32.totalorder %s210_s18, %s210_s18 }
  0x13   :  { %p217_p8 = por %p216_p7, %p215_p6 }
  0x15   :  { %p218_p9 = pnand %p217_p8, %p211_p5 }
  0x17   :  { %221 = shalt.err (!%p218_p9)
}
  0x18   :  { %33 = dma.hbm_to_vmem [thread:$0]  %s279_s1, 256, %s28_s17, [#allocation6], %s249_s12, %s249_s12, %s250_s13  }
  0x19   :  { %242 = dma.done.wait [#allocation3], 256  }
  0x1a   :  { %243 = vsyncadd [#allocation3], 4294967040 }
  0x1b   :  { %244 = dma.done.wait [#allocation6], 256  }
  0x1c   :  { %245 = vsyncadd [#allocation6], 4294967040  ;;  %v252_v0 = vmov 0.0   ;;  %v40_v1 = vld [vmem:[#allocation2] sm:$0xff]  ;;  %v41_v2 = vld [vmem:[#allocation2 + $0x8] sm:$0xff]  ;;  %s253_s0 = smov [#allocation7]  }
  0x1d   :  { %144 = vst [vmem:[#allocation7] sm:$0xff] %v252_v0  ;;  %v92_v3 = vld [vmem:[#allocation5] sm:$0xff]  ;;  %v42_v4 = vadd.f32 %v41_v2, %v40_v1  ;;  %v93_v5 = vld [vmem:[#allocation5 + $0x8] sm:$0xff]  ;;  %s166_s1 = sshll.u32 %s253_s0, 4  ;;  %s167_s1 = int_to_ptr.vmem [resolvable:$true] %s166_s1 }
  0x1e   :  { %v94_v6 = vadd.f32 %v93_v5, %v92_v3  ;;  %s222_s21 = scalar_lea.vmem %s167_s1, 128  ;;  %p227_p11 = scmp.lt.s32.totalorder %s167_s1, %s167_s1 }
  0x1f   :  { %v43_v7 = vrot.slane %v42_v4, 4  ;;  %p223_p10 = scmp.ne.s32.totalorder %s167_s1, %s222_s21  ;;  %p228_p12 = scmp.lt.s32.totalorder %s222_s21, %s222_s21 }
  0x20   :  { %v95_v8 = vrot.slane %v94_v6, 4 }
  0x21   :  { %v44_v9 = vadd.f32 %v43_v7, %v42_v4  ;;  %p229_p13 = por %p228_p12, %p227_p11 }
  0x22   :  { %v96_v10 = vadd.f32 %v95_v8, %v94_v6 }
  0x23   :  { %v45_v11 = vrot.slane %v44_v9, 2  ;;  %p230_p0 = pnand %p229_p13, %p223_p10 }
  0x24   :  { %v97_v12 = vrot.slane %v96_v10, 2 }
  0x25   :  { %v46_v13 = vadd.f32 %v45_v11, %v44_v9 }
  0x26   :  { %v98_v14 = vadd.f32 %v97_v12, %v96_v10 }
  0x27   :  { %v47_v15 = vrot.slane %v46_v13, 1 }
  0x28   :  { %v99_v16 = vrot.slane %v98_v14, 1 }
  0x29   :  { %v48_v17 = vadd.f32 %v47_v15, %v46_v13 }
  0x2a   :  { %v100_v18 = vadd.f32 %v99_v16, %v98_v14 }
  0x2b   :  { %v49_v19 = vmul.f32 0.0625, %v48_v17 }
  0x2c   :  { %v101_v20 = vmul.f32 0.0625, %v100_v18 }
  0x2d   :  { %v50_v21 = vsub.f32 %v40_v1, %v49_v19  ;;  %v51_v22 = vsub.f32 %v41_v2, %v49_v19 }
  0x2e   :  { %v102_v23 = vsub.f32 %v92_v3, %v101_v20  ;;  %v103_v24 = vsub.f32 %v93_v5, %v101_v20  ;;  %v145_v25 = vsub.f32 %v49_v19, %v101_v20 }
  0x2f   :  { %v52_v26 = vmul.f32 %v50_v21, %v50_v21  ;;  %v53_v27 = vmul.f32 %v51_v22, %v51_v22 }
  0x30   :  { %v146_v28 = vmul.f32 %v145_v25, %v145_v25  ;;  %v104_v29 = vmul.f32 %v102_v23, %v102_v23  ;;  %v105_v30 = vmul.f32 %v103_v24, %v103_v24 }
  0x31   :  { %v54_v31 = vadd.f32 %v53_v27, %v52_v26  ;;  %v62_v32 = vmul.f32 %v52_v26, %v50_v21  ;;  %v63_v33 = vmul.f32 %v53_v27, %v51_v22 }
  0x32   :  { %147 = vst [vmem:[#allocation7] sm:$0x1] %v146_v28  ;;  %v106_v34 = vadd.f32 %v105_v30, %v104_v29  ;;  %v114_v35 = vmul.f32 %v104_v29, %v102_v23  ;;  %v115_v36 = vmul.f32 %v105_v30, %v103_v24 }
  0x33   :  { %v55_v37 = vrot.slane %v54_v31, 4  ;;  %v64_v38 = vadd.f32 %v63_v33, %v62_v32  ;;  %v72_v39 = vmul.f32 %v62_v32, %v50_v21  ;;  %v73_v40 = vmul.f32 %v63_v33, %v51_v22 }
  0x34   :  { %v107_v41 = vrot.slane %v106_v34, 4  ;;  %v116_v42 = vadd.f32 %v115_v36, %v114_v35  ;;  %v124_v43 = vmul.f32 %v114_v35, %v102_v23  ;;  %v125_v44 = vmul.f32 %v115_v36, %v103_v24 }
  0x35   :  { %v56_v45 = vadd.f32 %v55_v37, %v54_v31  ;;  %v65_v46 = vrot.slane %v64_v38, 4  ;;  %v74_v47 = vadd.f32 %v73_v40, %v72_v39  ;;  %v82_v48 = vmul.f32 %v72_v39, %v50_v21 }
  0x36   :  { %v108_v49 = vadd.f32 %v107_v41, %v106_v34  ;;  %v117_v50 = vrot.slane %v116_v42, 4  ;;  %v126_v51 = vadd.f32 %v125_v44, %v124_v43  ;;  %v83_v52 = vmul.f32 %v73_v40, %v51_v22 }
  0x37   :  { %v57_v53 = vrot.slane %v56_v45, 2  ;;  %v66_v54 = vadd.f32 %v65_v46, %v64_v38  ;;  %v75_v55 = vrot.slane %v74_v47, 4  ;;  %v134_v56 = vmul.f32 %v124_v43, %v102_v23 }
  0x38   :  { %v109_v57 = vrot.slane %v108_v49, 2  ;;  %v118_v58 = vadd.f32 %v117_v50, %v116_v42  ;;  %v127_v59 = vrot.slane %v126_v51, 4  ;;  %v84_v60 = vadd.f32 %v83_v52, %v82_v48 }
  0x39   :  { %v58_v61 = vadd.f32 %v57_v53, %v56_v45  ;;  %v67_v62 = vrot.slane %v66_v54, 2  ;;  %v76_v63 = vadd.f32 %v75_v55, %v74_v47  ;;  %v135_v0 = vmul.f32 %v125_v44, %v103_v24 }
  0x3a   :  { %v110_v1 = vadd.f32 %v109_v57, %v108_v49  ;;  %v119_v2 = vrot.slane %v118_v58, 2  ;;  %v128_v3 = vadd.f32 %v127_v59, %v126_v51  ;;  %v85_v4 = vrot.slane %v84_v60, 4 }
  0x3b   :  { %v59_v5 = vrot.slane %v58_v61, 1  ;;  %v68_v6 = vadd.f32 %v67_v62, %v66_v54  ;;  %v77_v7 = vrot.slane %v76_v63, 2  ;;  %v136_v8 = vadd.f32 %v135_v0, %v134_v56 }
  0x3c   :  { %v111_v9 = vrot.slane %v110_v1, 1  ;;  %v120_v10 = vadd.f32 %v119_v2, %v118_v58  ;;  %v129_v11 = vrot.slane %v128_v3, 2  ;;  %v86_v12 = vadd.f32 %v85_v4, %v84_v60 }
  0x3d   :  { %v60_v13 = vadd.f32 %v59_v5, %v58_v61  ;;  %v69_v14 = vrot.slane %v68_v6, 1  ;;  %v78_v15 = vadd.f32 %v77_v7, %v76_v63  ;;  %v137_v16 = vrot.slane %v136_v8, 4 }
  0x3e   :  { %v112_v17 = vadd.f32 %v111_v9, %v110_v1  ;;  %v121_v18 = vrot.slane %v120_v10, 1  ;;  %v130_v19 = vadd.f32 %v129_v11, %v128_v3  ;;  %v87_v20 = vrot.slane %v86_v12, 2 }
  0x3f   :  { %v61_v21 = vmul.f32 0.0625, %v60_v13  ;;  %v70_v22 = vadd.f32 %v69_v14, %v68_v6  ;;  %v79_v23 = vrot.slane %v78_v15, 1  ;;  %v138_v24 = vadd.f32 %v137_v16, %v136_v8 }
  0x40   :  { %v113_v25 = vmul.f32 0.0625, %v112_v17  ;;  %v122_v26 = vadd.f32 %v121_v18, %v120_v10  ;;  %v131_v27 = vrot.slane %v130_v19, 1  ;;  %v88_v28 = vadd.f32 %v87_v20, %v86_v12 }
  0x41   :  { %v71_v29 = vmul.f32 0.0625, %v70_v22  ;;  %v80_v30 = vadd.f32 %v79_v23, %v78_v15  ;;  %v139_v31 = vrot.slane %v138_v24, 2 }
  0x42   :  { %v148_v32 = vsub.f32 %v61_v21, %v113_v25  ;;  %v123_v33 = vmul.f32 0.0625, %v122_v26  ;;  %v132_v34 = vadd.f32 %v131_v27, %v130_v19  ;;  %v89_v35 = vrot.slane %v88_v28, 1 }
  0x43   :  { %v81_v36 = vmul.f32 0.0625, %v80_v30  ;;  %v140_v37 = vadd.f32 %v139_v31, %v138_v24 }
  0x44   :  { %v149_v38 = vmul.f32 %v148_v32, %v148_v32  ;;  %v151_v39 = vsub.f32 %v71_v29, %v123_v33  ;;  %v133_v40 = vmul.f32 0.0625, %v132_v34  ;;  %v90_v41 = vadd.f32 %v89_v35, %v88_v28 }
  0x45   :  { %v141_v42 = vrot.slane %v140_v37, 1 }
  0x46   :  { %150 = vst [vmem:[#allocation7 + $0x1] sm:$0x1] %v149_v38  ;;  %v152_v43 = vmul.f32 %v151_v39, %v151_v39  ;;  %v154_v44 = vsub.f32 %v81_v36, %v133_v40  ;;  %v91_v45 = vmul.f32 0.0625, %v90_v41 }
  0x47   :  { %v142_v46 = vadd.f32 %v141_v42, %v140_v37 }
  0x48   :  { %153 = vst [vmem:[#allocation7 + $0x2] sm:$0x1] %v152_v43  ;;  %v155_v47 = vmul.f32 %v154_v44, %v154_v44 }
  0x49   :  { %v143_v48 = vmul.f32 0.0625, %v142_v46 }
  0x4a   :  { %156 = vst [vmem:[#allocation7 + $0x3] sm:$0x1] %v155_v47 }
  0x4b   :  { %v157_v49 = vsub.f32 %v91_v45, %v143_v48 }
  0x4d   :  { %v158_v50 = vmul.f32 %v157_v49, %v157_v49 }
  0x4f   :  { %159 = vst [vmem:[#allocation7 + $0x4] sm:$0x1] %v158_v50 }
  0x50   :  { %233 = shalt.err (!%p230_p0)
}
  0x51   :  { %169 = dma.vmem_to_hbm [thread:$0]  %s167_s1, 128, %s280_s2, [#allocation4]  }
  0x52   :  { %246 = dma.done.wait [#allocation4], 128  }
  0x53   :  { %247 = vsyncadd [#allocation4], 4294967168 }
  0x54   :  { %173 = vsyncpa [#allocation3], 1 }
  0x55   :  { %174 = vsyncpa [#allocation6], 1 }
  0x56   :  { %175 = vsyncpa [#allocation4], 1 }

</bundles_post_ra>
